<compile_context>
chip_gen: v6e
topology: v6e:2x2x1
jax: 0.10.0
libtpu: 0.0.40
codegen_flags: <defaults>
</compile_context>

<pallas_src>
import jax
import jax.numpy as jnp
from jax.experimental import pallas as pl
from jax.experimental.pallas import tpu as pltpu

REPL = 5  # cat([m, m, cat([m, m], 1), m], 1) == 5 column copies of m (valid because N == 1)


# ---------------------------------------------------------------------------
# Single-problem kernel: exact module shapes (2,5) x (5,1) -> (2,5).
# Gridless, whole arrays in single VMEM tiles; compute is at the floor.
# ---------------------------------------------------------------------------
def cat_mm_kernel(x1_ref, x2row_ref, o_ref):
    # x1_ref:    (M, K)  -- K along lanes
    # x2row_ref: (1, K)  -- x2 pre-transposed in the wrapper, lane-aligned with x1
    # Force f32 accumulation (matches torch.mm; keeps v5e off the bf16 VALU path).
    prod = x1_ref[...].astype(jnp.float32) * x2row_ref[...].astype(jnp.float32)
    m = jnp.sum(prod, axis=1, keepdims=True)                    # (M, 1) XLU lane-reduce
    # Every concatenated piece equals m (N == 1): the cat is pure column
    # replication -> one broadcast store into a single output vreg tile.
    o_ref[...] = jnp.broadcast_to(m, o_ref.shape).astype(o_ref.dtype)


def cat_mm(x1, x2):
    M, K = x1.shape
    K2, N = x2.shape
    assert K == K2
    assert N == 1, "cat_mm fused kernel requires x2 to have a single column"
    assert x1.dtype == x2.dtype, "torch.mm requires matching dtypes"

    # Layout plumbing only: present x2 as a lane-aligned (1, K) row so the
    # kernel needs no in-kernel sublane->lane relayout.
    x2_row = jnp.reshape(x2, (1, K))

    out_shape = jax.ShapeDtypeStruct((M, N * REPL), x1.dtype)
    return pl.pallas_call(
        cat_mm_kernel,
        out_shape=out_shape,
        # Whole-array VMEM specs: one DMA per operand, no grid loop machinery.
        in_specs=[
            pl.BlockSpec(memory_space=pltpu.MemorySpace.VMEM),
            pl.BlockSpec(memory_space=pltpu.MemorySpace.VMEM),
        ],
        out_specs=pl.BlockSpec(memory_space=pltpu.MemorySpace.VMEM),
        compiler_params=pltpu.CompilerParams(
            # Let XLA fuse the x2 reshape (and other cheap producers) into the
            # custom-call operands instead of emitting them as standalone ops.
            allow_input_fusion=[True, True],
        ),
        cost_estimate=pl.CostEstimate(
            flops=2 * M * K * N,
            transcendentals=0,
            bytes_accessed=(M * K + K * N + M * N * REPL) * x1.dtype.itemsize,
        ),
    )(x1, x2_row)


# ---------------------------------------------------------------------------
# Batched variant (the structural win from the perf review): B independent
# (x1, x2) problems in ONE pallas_call. Batch lives on the lane axis so both
# loads and the store are full, unmasked vregs; the batch grid axis is
# "parallel" so v7x's two TensorCores split it.
# ---------------------------------------------------------------------------
def cat_mm_batched_kernel(x1t_ref, x2t_ref, m_ref):
    # x1t_ref: (M, K, TB)   batch on lanes
    # x2t_ref: (K, TB)
    # m_ref:   (M, TB)      lane-dense output slab (TB = 128)
    x1f = x1t_ref[...].astype(jnp.float32)
    x2f = x2t_ref[...].astype(jnp.float32)
    # Per-lane (= per-problem) K-reduction on sublanes; f32 accumulation.
    m_ref[...] = jnp.sum(x1f * x2f[None, :, :], axis=1).astype(m_ref.dtype)


def cat_mm_batched(x1b, x2b, *, lane_block=128):
    B, M, K = x1b.shape
    Bb, Kb, N = x2b.shape
    assert B == Bb and K == Kb
    assert N == 1, "fused cat_mm requires x2 to have a single column"
    assert x1b.dtype == x2b.dtype, "torch.mm requires matching dtypes"

    # Layout plumbing only (wrapper-side): put the batch on lanes.
    x1t = jnp.transpose(x1b, (1, 2, 0))          # (M, K, B)
    x2t = jnp.transpose(x2b[:, :, 0], (1, 0))    # (K, B)

    # Pad batch to a lane-block multiple; padded lanes are independent garbage
    # (no cross-problem reduction) and are sliced off below.
    Bp = pl.cdiv(B, lane_block) * lane_block
    if Bp != B:
        x1t = jnp.pad(x1t, ((0, 0), (0, 0), (0, Bp - B)))
        x2t = jnp.pad(x2t, ((0, 0), (0, Bp - B)))

    # Per-step VMEM: (M*K + K + M) * 128 * 4B * double-buffering  ~= a few KiB,
    # comfortably under the v7x 32 MiB scoped / 64 MiB physical budget too.
    m_slab = pl.pallas_call(
        cat_mm_batched_kernel,
        out_shape=jax.ShapeDtypeStruct((M, Bp), x1b.dtype),
        grid_spec=pltpu.PrefetchScalarGridSpec(
            num_scalar_prefetch=0,
            grid=(Bp // lane_block,),
            in_specs=[
                pl.BlockSpec((M, K, lane_block), lambda b: (0, 0, b)),
                pl.BlockSpec((K, lane_block), lambda b: (0, b)),
            ],
            out_specs=pl.BlockSpec((M, lane_block), lambda b: (0, b)),
        ),
        compiler_params=pltpu.CompilerParams(
            # v7x: shard the batch axis across both TensorCores (no-op on v5e/v6e).
            dimension_semantics=("parallel",),
        ),
        cost_estimate=pl.CostEstimate(
            flops=2 * Bp * M * K,
            transcendentals=0,
            bytes_accessed=(M * K * Bp + K * Bp + M * Bp) * x1b.dtype.itemsize,
        ),
    )(x1t, x2t)

    # The two torch.cat's: every output column equals m, so the final shape is
    # a pure broadcast (fused by XLA into the consumer) — no masked stores.
    m_slab = m_slab[:, :B]                                   # drop lane padding
    return jnp.broadcast_to(jnp.transpose(m_slab)[:, :, None], (B, M, REPL))


if __name__ == "__main__":
    key = jax.random.PRNGKey(0)
    k1, k2, k3, k4 = jax.random.split(key, 4)

    # --- single problem: exact module shapes -------------------------------
    x1 = jax.random.normal(k1, (2, 5), dtype=jnp.float32)
    x2 = jax.random.normal(k2, (5, 1), dtype=jnp.float32)
    out = jax.block_until_ready(cat_mm(x1, x2))

    m = x1 @ x2
    v1 = jnp.concatenate([m, m], axis=1)
    ref = jnp.concatenate([m, m, v1, m], axis=1)
    assert out.shape == ref.shape == (2, 5)
    assert jnp.allclose(out, ref, atol=1e-5, rtol=1e-5)

    # --- batched structural variant (one pallas_call for B problems) -------
    B = 256
    x1b = jax.random.normal(k3, (B, 2, 5), dtype=jnp.float32)
    x2b = jax.random.normal(k4, (B, 5, 1), dtype=jnp.float32)
    outb = jax.block_until_ready(cat_mm_batched(x1b, x2b))

    mb = jnp.einsum("bik,bkn->bin", x1b, x2b)
    v1b = jnp.concatenate([mb, mb], axis=2)
    refb = jnp.concatenate([mb, mb, v1b, mb], axis=2)
    assert outb.shape == refb.shape == (B, 2, REPL)
    assert jnp.allclose(outb, refb, atol=1e-5, rtol=1e-5)

    print("KERNEL_OK")
</pallas_src>

<mosaic_0001>
module attributes {stable_mosaic.version = 11 : i64} {
  func.func @cat_mm_kernel(%arg0: memref<2x5xf32, #tpu.memory_space<vmem>>, %arg1: memref<1x5xf32, #tpu.memory_space<vmem>>, %arg2: memref<2x5xf32, #tpu.memory_space<vmem>>) attributes {dimension_semantics = [], scalar_prefetch = 0 : i64, scratch_operands = 0 : i64, tpu.core_type = #tpu.core_type<tc>} {
    %c0 = arith.constant 0 : index
    %c0_0 = arith.constant 0 : index
    %0 = vector.load %arg0[%c0, %c0_0] : memref<2x5xf32, #tpu.memory_space<vmem>>, vector<2x5xf32>
    %c0_1 = arith.constant 0 : index
    %c0_2 = arith.constant 0 : index
    %1 = vector.load %arg1[%c0_1, %c0_2] : memref<1x5xf32, #tpu.memory_space<vmem>>, vector<1x5xf32>
    %2 = vector.broadcast %1 : vector<1x5xf32> to vector<2x5xf32>
    %3 = arith.mulf %0, %2 : vector<2x5xf32>
    %cst = arith.constant dense<0.000000e+00> : vector<2xf32>
    %4 = vector.multi_reduction <add>, %3, %cst [1] : vector<2x5xf32> to vector<2xf32>
    %5 = vector.shape_cast %4 : vector<2xf32> to vector<2x1xf32>
    %6 = vector.shape_cast %5 : vector<2x1xf32> to vector<2x1xf32>
    %7 = vector.broadcast %6 : vector<2x1xf32> to vector<2x5xf32>
    %c0_3 = arith.constant 0 : index
    %c0_4 = arith.constant 0 : index
    %8 = vector.load %arg2[%c0_3, %c0_4] : memref<2x5xf32, #tpu.memory_space<vmem>>, vector<2x5xf32>
    tpu.vector_store %arg2[%c0_3, %c0_4], %7 {strides = array<i32>} : memref<2x5xf32, #tpu.memory_space<vmem>>, vector<2x5xf32>,
    return
  }
}

</mosaic_0001>

<bundles_post_ra>
// kernel: tpu_custom_call.1
= control target key start
LH: loop header
LB: loop body
LE: loop exit
PB: predicated region body
PF: predicated region fallthrough
CT: control target
= control target key end

     0   :  { %7 = vsyncpa [#allocation3], 0  ;;  %s126_s0 = inlined_call_operand.hbm [shape: f32[2,5], index: 0, kind: input, shape index: {}]   ;;  %s127_s1 = inlined_call_operand.vmem [shape: f32[1,5], index: 1, kind: input, shape index: {}]   ;;  %s128_s2 = inlined_call_operand.hbm [shape: f32[2,5], index: 2, kind: output, shape index: {}]  }
   0x1   :  { %8 = vsyncpa [#allocation4], 0  ;;  %s100_s9 = smov [#allocation2]  }
   0x2   :  { %s15_s10 = sshll.u32 %s100_s9, 4  ;;  %s16_s10 = int_to_ptr.vmem [resolvable:$true] %s15_s10 }
   0x3   :  { %s64_s11 = scalar_lea.vmem %s16_s10, 32  ;;  %p69_p1 = scmp.lt.s32.totalorder %s16_s10, %s16_s10 }
   0x4   :  { %p65_p0 = scmp.ne.s32.totalorder %s16_s10, %s64_s11  ;;  %p70_p2 = scmp.lt.s32.totalorder %s64_s11, %s64_s11 }
   0x6   :  { %p71_p3 = por %p70_p2, %p69_p1 }
   0x8   :  { %p72_p4 = pnand %p71_p3, %p65_p0 }
   0xa   :  { %75 = shalt.err (!%p72_p4)
}
   0xb   :  { %18 = dma.hbm_to_vmem [thread:$0]  %s126_s0, 32, %s16_s10, [#allocation3]  }
   0xc   :  { %96 = dma.done.wait [#allocation3], 32  }
   0xd   :  { %97 = vsyncadd [#allocation3], 4294967264  ;;  %v24_v0 = vld [vmem:[#allocation2] sm:$0x3]  ;;  %vm33_vm0 = vcmask 33792   ;;  %s101_s16 = smov [#allocation5]  }
   0xe   :  { %v53_v1 = vld [vmem:[%s127_s1] ss:$0 sm:$0xff]  ;;  %s44_s17 = sshll.u32 %s101_s16, 4  ;;  %s45_s17 = int_to_ptr.vmem [resolvable:$true] %s44_s17 }
   0xf   :  { %v32_v2 = vmul.f32 %v53_v1, %v24_v0  ;;  %s76_s18 = scalar_lea.vmem %s45_s17, 32  ;;  %p81_p6 = scmp.lt.s32.totalorder %s45_s17, %s45_s17 }
  0x10   :  { %p77_p5 = scmp.ne.s32.totalorder %s45_s17, %s76_s18  ;;  %p82_p7 = scmp.lt.s32.totalorder %s76_s18, %s76_s18 }
  0x11   :  { %v34_v3 = vsel %vm33_vm0, %v32_v2, 0.0 }
  0x12   :  { %35 = vadd.xlane.f32.xlu0 %v34_v3  ;;  %p83_p8 = por %p82_p7, %p81_p6 }
  0x14   :  { %p84_p9 = pnand %p83_p8, %p77_p5 }
  0x9b   :  { %v36_v4 = vpop.xlane.xlu0 %35 }
  0x9c   :  { %37 = vst.msk [vmem:[#allocation5] sm:$0x3] %vm33_vm0, %v36_v4 }
  0x9d   :  { %87 = shalt.err (!%p84_p9)
}
  0x9e   :  { %47 = dma.vmem_to_hbm [thread:$0]  %s45_s17, 32, %s128_s2, [#allocation4]  }
  0x9f   :  { %98 = dma.done.wait [#allocation4], 32  }
  0xa0   :  { %99 = vsyncadd [#allocation4], 4294967264 }
  0xa1   :  { %51 = vsyncpa [#allocation3], 1 }
  0xa2   :  { %52 = vsyncpa [#allocation4], 1 }

</bundles_post_ra>
